<compile_context>
chip_gen: v7x
topology: tpu7x:2x2x1
jax: 0.10.0
libtpu: 0.0.40
codegen_flags: <defaults>
</compile_context>

<pallas_src>
import math

import jax
import jax.numpy as jnp
from jax.experimental import pallas as pl
from jax.experimental.pallas import tpu as pltpu


def _copy_kernel(x_ref, o_ref):
    # Straight VMEM copy of the current (TILE_M, N_COLS) tile.
    o_ref[...] = x_ref[...]


def _resolve_outer_shape(outer_shape, n_feat):
    """Supports torch.view's single -1 inferred dimension."""
    outer = list(outer_shape)
    neg = [i for i, d in enumerate(outer) if d == -1]
    if len(neg) > 1:
        raise ValueError("only one -1 allowed in outer_shape")
    known = 1
    for d in outer:
        if d != -1:
            known *= d
    if neg:
        if known == 0 or n_feat % known != 0:
            raise ValueError("outer_shape incompatible with input size")
        outer[neg[0]] = n_feat // known
    else:
        if known != n_feat:
            raise ValueError("outer_shape incompatible with input size")
    return tuple(outer)


def _choose_cols(total):
    """Largest 'nice' lane-dense column count dividing the flattened size."""
    for cand in (1024, 512, 256, 128):
        if total % cand == 0:
            return cand
    return 0  # not lane-tileable


def _choose_tile_m(rows, n_cols, itemsize):
    """Sublane-multiple row tile sized to ~2 MiB per buffer."""
    sub = max(8, 32 // itemsize)          # 8 f32 / 16 bf16 / 32 int8
    target_bytes = 2 * 1024 * 1024        # per-buffer tile target
    tile_m = (target_bytes // (n_cols * itemsize)) // sub * sub
    tile_m = max(sub, tile_m)
    rows_pad = ((rows + sub - 1) // sub) * sub
    return min(tile_m, rows_pad)


def _pallas_copy_2d(x2d):
    """Sublane/lane-dense tiled identity copy (fusion anchor only)."""
    total = x2d.size
    itemsize = jnp.dtype(x2d.dtype).itemsize
    n_cols = _choose_cols(total)
    if n_cols == 0:
        # Not lane-tileable; a copy kernel buys nothing here anyway.
        return x2d

    rows = total // n_cols
    slab = x2d.reshape(rows, n_cols)           # metadata only
    tile_m = _choose_tile_m(rows, n_cols, itemsize)
    grid = (pl.cdiv(rows, tile_m),)

    out = pl.pallas_call(
        _copy_kernel,
        out_shape=jax.ShapeDtypeStruct((rows, n_cols), slab.dtype),
        grid=grid,
        in_specs=[pl.BlockSpec((tile_m, n_cols), lambda i: (i, 0))],
        out_specs=pl.BlockSpec((tile_m, n_cols), lambda i: (i, 0)),
        compiler_params=pltpu.CompilerParams(
            # Independent row tiles -> shard across v7x's two TensorCores.
            dimension_semantics=("parallel",),
        ),
        cost_estimate=pl.CostEstimate(
            flops=0, transcendentals=0,
            bytes_accessed=2 * total * itemsize),
    )(slab)
    return out.reshape(x2d.shape)              # metadata only


def reshape_forward(x, outer_shape, use_pallas_copy=False):
    """Pallas implementation of Reshape.forward.

    x:           array of shape (B, ...) (e.g. NCHW)
    outer_shape: tuple; prod(outer_shape) must equal prod(x.shape[1:]),
                 a single -1 entry is inferred (torch.view semantics)
    use_pallas_copy: if True, route the data through a Pallas identity-copy
                 kernel (fusion anchor).  Default False: the reshape is a
                 free metadata op, exactly like torch's .view.
    """
    B = x.shape[0]
    n_feat = math.prod(x.shape[1:]) if x.ndim > 1 else 1
    outer = _resolve_outer_shape(outer_shape, n_feat)

    x2d = x.reshape(B, n_feat)                 # metadata only
    if use_pallas_copy:
        x2d = _pallas_copy_2d(x2d)
    return x2d.reshape((B,) + outer)           # metadata only


if __name__ == "__main__":
    key = jax.random.PRNGKey(0)

    # Test 1: small NCHW feature map, explicit outer shape.
    # Default (recommended) path: pure metadata reshape, zero HBM traffic.
    B, C, H, W = 2, 4, 16, 16                  # n_feat = 1024
    x = jax.random.normal(key, (B, C, H, W), dtype=jnp.float32)
    outer_shape = (8, 128)
    out = jax.block_until_ready(reshape_forward(x, outer_shape))
    ref = x.reshape((B,) + outer_shape)
    assert out.shape == (B,) + outer_shape
    assert out.dtype == x.dtype
    assert jnp.array_equal(out, ref)

    # Test 1b: same shapes through the Pallas copy kernel (fusion anchor),
    # exercising the sublane-dense (TILE_M, N_COLS) tiling once on-device.
    out_k = jax.block_until_ready(
        reshape_forward(x, outer_shape, use_pallas_copy=True))
    assert out_k.shape == (B,) + outer_shape
    assert out_k.dtype == x.dtype
    assert jnp.array_equal(out_k, ref)

    # Test 2: larger feature axis + torch-style -1 inferred dimension,
    # through the kernel path (multi-row slab, ragged-block masking OK).
    B2, C2, H2, W2 = 2, 8, 32, 32              # n_feat = 8192
    x2 = jax.random.normal(jax.random.PRNGKey(0), (B2, C2, H2, W2),
                           dtype=jnp.float32)
    out2 = jax.block_until_ready(
        reshape_forward(x2, (-1, 256), use_pallas_copy=True))
    ref2 = x2.reshape(B2, 32, 256)
    assert out2.shape == (B2, 32, 256)
    assert out2.dtype == x2.dtype
    assert jnp.array_equal(out2, ref2)

    print("KERNEL_OK")
</pallas_src>

<mosaic_0001>
module attributes {stable_mosaic.version = 11 : i64} {
  func.func @_copy_kernel(%arg0: i32, %arg1: memref<8x1024xf32, #tpu.memory_space<vmem>>, %arg2: memref<8x1024xf32, #tpu.memory_space<vmem>>) attributes {dimension_semantics = [#tpu.dimension_semantics<parallel>], iteration_bounds = array<i64: 1>, scalar_prefetch = 0 : i64, scratch_operands = 0 : i64, tpu.core_type = #tpu.core_type<tc>, window_params = [{transform_indices = @transform_0, window_bounds = array<i64: 8, 1024>}, {transform_indices = @transform_1, window_bounds = array<i64: 8, 1024>}]} {
    %c0 = arith.constant 0 : index
    %c0_0 = arith.constant 0 : index
    %0 = vector.load %arg1[%c0, %c0_0] : memref<8x1024xf32, #tpu.memory_space<vmem>>, vector<8x1024xf32>
    %c0_1 = arith.constant 0 : index
    %c0_2 = arith.constant 0 : index
    %1 = vector.load %arg2[%c0_1, %c0_2] : memref<8x1024xf32, #tpu.memory_space<vmem>>, vector<8x1024xf32>
    tpu.vector_store %arg2[%c0_1, %c0_2], %0 {strides = array<i32>} : memref<8x1024xf32, #tpu.memory_space<vmem>>, vector<8x1024xf32>,
    return
  }
  func.func @transform_0(%arg0: i32) -> (i32, i32) {
    %c0_i32 = arith.constant 0 : i32
    %c0_i32_0 = arith.constant 0 : i32
    return %arg0, %c0_i32 : i32, i32
  }
  func.func @transform_1(%arg0: i32) -> (i32, i32) {
    %c0_i32 = arith.constant 0 : i32
    %c0_i32_0 = arith.constant 0 : i32
    return %arg0, %c0_i32 : i32, i32
  }
}

</mosaic_0001>

<bundles_post_ra>
// kernel: tpu_custom_call.1
= control target key start
LH: loop header
LB: loop body
LE: loop exit
PB: predicated region body
PF: predicated region fallthrough
CT: control target
= control target key end

     0   :  { %6 = vsyncpa [#allocation3], 0  ;;  %s152_s0 = inlined_call_operand.hbm [shape: f32[2,1024], index: 0, kind: input, shape index: {}]   ;;  %s153_s1 = inlined_call_operand.hbm [shape: f32[2,1024], index: 1, kind: output, shape index: {}]  }
   0x1   :  { %7 = vsyncpa [#allocation4], 0 }
   0x2   :  { %12 = vsyncadd [#allocation3], 768  ;;  %s108_s6 = smov [#allocation2]   ;;  %s60_s10 = scalar_lea.hbm %s152_s0, 256 }
   0x3   :  { %s13_s7 = sshll.u32 %s108_s6, 4  ;;  %p61_p0 = scmp.ne.s32.totalorder %s152_s0, %s60_s10  ;;  %s14_s7 = int_to_ptr.vmem [resolvable:$true] %s13_s7 }
   0x4   :  { %p64_p1 = scmp.lt.u32.totalorder %s60_s10, %s152_s0 }
   0x6   :  { %p66_p2 = pnand %p64_p1, %p61_p0 }
   0x8   :  { %69 = shalt.err (!%p66_p2)
}
   0x9   :  { %s70_s15 = scalar_lea.vmem %s14_s7, 256  ;;  %s74_s16 = scalar_lea.vmem %s14_s7, 1024 }
   0xa   :  { %p71_p3 = scmp.ne.s32.totalorder %s14_s7, %s70_s15  ;;  %p75_p4 = scmp.lt.s32.totalorder %s14_s7, %s14_s7 }
   0xb   :  { %p76_p5 = scmp.lt.s32.totalorder %s74_s16, %s70_s15 }
   0xd   :  { %p77_p6 = por %p76_p5, %p75_p4 }
   0xf   :  { %p78_p7 = pnand %p77_p6, %p71_p3 }
  0x11   :  { %81 = shalt.err (!%p78_p7)
}
  0x12   :  { %s109_s17 = smov 256   ;;  %s110_s18 = smov 16  }
  0x13   :  { %19 = dma.hbm_to_vmem [thread:$0]  %s152_s0, 256, %s14_s7, [#allocation3], %s109_s17, %s109_s17, %s110_s18  }
  0x14   :  { %104 = dma.done.wait [#allocation3], 1024  }
  0x15   :  { %105 = vsyncadd [#allocation3], 4294966272  ;;  %v23_v0 = vld [vmem:[#allocation2] sm:$0xff]  ;;  %v24_v1 = vld [vmem:[#allocation2 + $0x8] sm:$0xff] }
  0x16   :  { %v25_v2 = vld [vmem:[#allocation2 + $0x10] sm:$0xff]  ;;  %31 = vst [vmem:[#allocation5] sm:$0xff] %v23_v0  ;;  %32 = vst [vmem:[#allocation5 + $0x8] sm:$0xff] %v24_v1  ;;  %v26_v3 = vld [vmem:[#allocation2 + $0x18] sm:$0xff] }
  0x17   :  { %33 = vst [vmem:[#allocation5 + $0x10] sm:$0xff] %v25_v2  ;;  %v27_v4 = vld [vmem:[#allocation2 + $0x20] sm:$0xff]  ;;  %v28_v5 = vld [vmem:[#allocation2 + $0x28] sm:$0xff]  ;;  %34 = vst [vmem:[#allocation5 + $0x18] sm:$0xff] %v26_v3 }
  0x18   :  { %35 = vst [vmem:[#allocation5 + $0x20] sm:$0xff] %v27_v4  ;;  %36 = vst [vmem:[#allocation5 + $0x28] sm:$0xff] %v28_v5  ;;  %v29_v6 = vld [vmem:[#allocation2 + $0x30] sm:$0xff]  ;;  %v30_v7 = vld [vmem:[#allocation2 + $0x38] sm:$0xff] }
  0x19   :  { %37 = vst [vmem:[#allocation5 + $0x30] sm:$0xff] %v29_v6  ;;  %38 = vst [vmem:[#allocation5 + $0x38] sm:$0xff] %v30_v7 }
  0x1a   :  { %43 = vsyncadd [#allocation4], 768  ;;  %s111_s0 = smov [#allocation5]  }
  0x1b   :  { %s44_s21 = sshll.u32 %s111_s0, 4  ;;  %s45_s21 = int_to_ptr.vmem [resolvable:$true] %s44_s21 }
  0x1c   :  { %s82_s22 = scalar_lea.vmem %s45_s21, 256  ;;  %s86_s23 = scalar_lea.vmem %s45_s21, 1024 }
  0x1d   :  { %p83_p8 = scmp.ne.s32.totalorder %s45_s21, %s82_s22  ;;  %p87_p9 = scmp.lt.s32.totalorder %s45_s21, %s45_s21 }
  0x1e   :  { %p88_p10 = scmp.lt.s32.totalorder %s86_s23, %s82_s22 }
  0x20   :  { %p89_p11 = por %p88_p10, %p87_p9 }
  0x22   :  { %p90_p12 = pnand %p89_p11, %p83_p8 }
  0x24   :  { %93 = shalt.err (!%p90_p12)
}
  0x25   :  { %s94_s26 = scalar_lea.hbm %s153_s1, 256 }
  0x26   :  { %p95_p13 = scmp.ne.s32.totalorder %s153_s1, %s94_s26  ;;  %p98_p0 = scmp.lt.u32.totalorder %s94_s26, %s153_s1 }
  0x28   :  { %p100_p1 = pnand %p98_p0, %p95_p13 }
  0x2a   :  { %103 = shalt.err (!%p100_p1)
}
  0x2b   :  { %50 = dma.vmem_to_hbm [thread:$0]  %s45_s21, 256, %s153_s1, [#allocation4], %s109_s17, %s109_s17, %s110_s18  }
  0x2c   :  { %106 = dma.done.wait [#allocation4], 1024  }
  0x2d   :  { %107 = vsyncadd [#allocation4], 4294966272 }
  0x2e   :  { %54 = vsyncpa [#allocation3], 1 }
  0x2f   :  { %55 = vsyncpa [#allocation4], 1 }

</bundles_post_ra>
